<compile_context>
chip_gen: v5e
topology: v5e:2x2
jax: 0.10.0
libtpu: 0.0.40
codegen_flags: <defaults>
</compile_context>

<pallas_src>
import functools

import jax
import jax.numpy as jnp
import numpy as np
from jax.experimental import pallas as pl
from jax.experimental.pallas import tpu as pltpu

EPS = 1e-5


def _encoder_block_kernel(x_ref, w1_ref, w2_ref,
                          g1_ref, b1_ref, g2_ref, b2_ref,
                          rm_ref, rtm_ref, ro_ref, rto_ref,
                          a_ref, o_ref, *, H, W):
    # x_ref : (N*H, W*Cin)        packed input, f32, VMEM
    # w1_ref: (3, W*Cin,  W*Cmid) banded conv1 weights, bf16
    # w2_ref: (3, W*Cmid, W*Cout) banded conv2 weights, bf16
    # g*/b* : (1, C)              BN affine params (per channel), f32
    # rm/ro : (W*C, C)            channel-gather matrices; rtm/rto transposes, f32
    # a_ref : (1, 1)              shared PReLU alpha, SMEM scalar
    # o_ref : (N*H, W*Cout)       packed output (lane-dense, unmasked stores)
    NH = x_ref.shape[0]
    inv_cnt = 1.0 / float(NH * W)                  # 1 / (N*H*W), static
    alpha = a_ref[0, 0]                            # scalar PReLU slope

    # Boundary masks for the dy row taps, hoisted once (shared by both convs).
    row = jax.lax.broadcasted_iota(jnp.int32, (NH, 1), 0)
    i_img = row % H                                # row index within its image
    mask_up = i_img != 0                           # dy=0 tap (row above) valid
    mask_dn = i_img != (H - 1)                     # dy=2 tap (row below) valid

    def conv3x3(x, wb_ref):
        # out = sum_dy shift_dy(x) @ B_dy ; shifts on XLU, taps on MXU (bf16 in,
        # f32 accumulation).  dy=1 needs no shift/mask -> use it to init acc.
        acc = jnp.dot(x.astype(jnp.bfloat16), wb_ref[1],
                      preferred_element_type=jnp.float32)
        x_up = jnp.where(mask_up, pltpu.roll(x, shift=1, axis=0), 0.0)
        acc = acc + jnp.dot(x_up.astype(jnp.bfloat16), wb_ref[0],
                            preferred_element_type=jnp.float32)
        x_dn = jnp.where(mask_dn, pltpu.roll(x, shift=NH - 1, axis=0), 0.0)  # == -1
        acc = acc + jnp.dot(x_dn.astype(jnp.bfloat16), wb_ref[2],
                            preferred_element_type=jnp.float32)
        return acc                                  # (NH, W*Cout), f32

    def bn_prelu(y, g_ref, b_ref, r_ref, rt_ref):
        # One sweep for both stats, one batched gather matmul, one batched
        # broadcast-back matmul, one FMA normalize pass.  All f32.
        stats = jnp.concatenate(
            [jnp.sum(y, axis=0, keepdims=True),
             jnp.sum(y * y, axis=0, keepdims=True)], axis=0)        # (2, W*C)
        stats_c = jnp.dot(stats, r_ref[...],
                          preferred_element_type=jnp.float32) * inv_cnt  # (2, C)
        mu_c = stats_c[0:1]
        var_c = stats_c[1:2] - mu_c * mu_c          # biased, training-mode variance
        scale_c = g_ref[...] * jax.lax.rsqrt(var_c + EPS)           # (1, C), EUP
        shift_c = b_ref[...] - mu_c * scale_c                       # (1, C)
        sb = jnp.dot(jnp.concatenate([scale_c, shift_c], axis=0), rt_ref[...],
                     preferred_element_type=jnp.float32)            # (2, W*C)
        yn = y * sb[0:1] + sb[1:2]                  # single fused normalize pass
        return jnp.where(yn >= 0.0, yn, alpha * yn)  # shared PReLU

    y1 = bn_prelu(conv3x3(x_ref[...], w1_ref), g1_ref, b1_ref, rm_ref, rtm_ref)
    y2 = bn_prelu(conv3x3(y1, w2_ref), g2_ref, b2_ref, ro_ref, rto_ref)
    o_ref[...] = y2.astype(o_ref.dtype)


# ---------- tiny constant operators (weight-sized, built once under jit) ----------

def _band_weights(w, W):
    # w: (3, 3, Cin, Cout) HWIO -> (3, W*Cin, W*Cout)
    # B[dy][jin*Cin + ci, j*Cout + co] = w[dy, dx, ci, co] with jin = j + dx - 1.
    # Out-of-range taps don't appear -> zero padding along W is built in.
    _, _, cin, cout = w.shape
    bands = []
    for dy in range(3):
        bdy = jnp.zeros((W * cin, W * cout), jnp.float32)
        for dx in range(3):
            shift = jnp.eye(W, W, k=1 - dx, dtype=jnp.float32)   # [jin, j] = 1
            bdy = bdy + jnp.kron(shift, w[dy, dx].astype(jnp.float32))
        bands.append(bdy)
    return jnp.stack(bands)


def _channel_gather(W, C):
    # R: (W*C, C) with R[j*C + c, k] = 1[c == k]  (collapses W positions per channel)
    return jnp.tile(jnp.eye(C, dtype=jnp.float32), (W, 1))


# ---------------------------------- wrapper ----------------------------------

def init_params(key, cin, cmid, cout):
    k1, k2, k3, k4, k5, k6 = jax.random.split(key, 6)
    w1 = jax.random.normal(k1, (3, 3, cin, cmid), jnp.float32) / np.sqrt(9 * cin)
    w2 = jax.random.normal(k2, (3, 3, cmid, cout), jnp.float32) / np.sqrt(9 * cmid)
    g1 = 1.0 + 0.1 * jax.random.normal(k3, (1, cmid), jnp.float32)
    b1 = 0.1 * jax.random.normal(k4, (1, cmid), jnp.float32)
    g2 = 1.0 + 0.1 * jax.random.normal(k5, (1, cout), jnp.float32)
    b2 = 0.1 * jax.random.normal(k6, (1, cout), jnp.float32)
    alpha = jnp.full((1, 1), 0.25, jnp.float32)  # nn.PReLU() default, shared
    return dict(w1=w1, w2=w2, g1=g1, b1=b1, g2=g2, b2=b2, alpha=alpha)


@jax.jit
def encoder_block(x_nchw, params):
    N, Cin, H, W = x_nchw.shape
    w1, w2 = params['w1'], params['w2']
    Cmid, Cout = w1.shape[-1], w2.shape[-1]

    # NCHW (PyTorch) -> channels-last packed (N*H, W*Cin).
    xp = jnp.transpose(x_nchw, (0, 2, 3, 1)).astype(jnp.float32)
    xp = xp.reshape(N * H, W * Cin)

    # bf16 banded weights: bf16-native MXU path on v6e/v7x, half the VMEM footprint.
    band1 = _band_weights(w1, W).astype(jnp.bfloat16)    # (3, W*Cin,  W*Cmid)
    band2 = _band_weights(w2, W).astype(jnp.bfloat16)    # (3, W*Cmid, W*Cout)
    rm = _channel_gather(W, Cmid)                        # (W*Cmid, Cmid)
    ro = _channel_gather(W, Cout)                        # (W*Cout, Cout)

    vmem = pl.BlockSpec(memory_space=pltpu.MemorySpace.VMEM)
    smem = pl.BlockSpec(memory_space=pltpu.MemorySpace.SMEM)
    kernel = functools.partial(_encoder_block_kernel, H=H, W=W)

    out_packed = pl.pallas_call(
        kernel,
        out_shape=jax.ShapeDtypeStruct((N * H, W * Cout), jnp.float32),
        in_specs=[vmem] * 11 + [smem],
        out_specs=vmem,
    )(xp, band1, band2,
      params['g1'], params['b1'], params['g2'], params['b2'],
      rm, rm.T, ro, ro.T, params['alpha'])

    return jnp.transpose(out_packed.reshape(N, H, W, Cout), (0, 3, 1, 2))


def reference(x_nchw, params):
    # Pure-JAX reference of the PyTorch forward (training-mode BN, shared PReLU),
    # with the same bf16 matmul-operand rounding points as the kernel so the
    # comparison isolates kernel correctness rather than bf16 vs f32 precision.
    x = jnp.transpose(x_nchw, (0, 2, 3, 1)).astype(jnp.float32)

    def conv(y, w):
        return jax.lax.conv_general_dilated(
            y.astype(jnp.bfloat16), w.astype(jnp.bfloat16), (1, 1), 'SAME',
            dimension_numbers=('NHWC', 'HWIO', 'NHWC'),
            preferred_element_type=jnp.float32)

    def bn(y, g, b):
        mu = jnp.mean(y, axis=(0, 1, 2), keepdims=True)
        var = jnp.mean(y * y, axis=(0, 1, 2), keepdims=True) - mu * mu
        return (y - mu) * (g.reshape(1, 1, 1, -1) * jax.lax.rsqrt(var + EPS)) \
               + b.reshape(1, 1, 1, -1)

    def prelu(y):
        a = params['alpha'][0, 0]
        return jnp.where(y >= 0, y, a * y)

    y = prelu(bn(conv(x, params['w1']), params['g1'], params['b1']))
    y = prelu(bn(conv(y, params['w2']), params['g2'], params['b2']))
    return jnp.transpose(y, (0, 3, 1, 2))


if __name__ == "__main__":
    key = jax.random.PRNGKey(0)
    kx, kp = jax.random.split(key)
    N, Cin, H, W = 2, 4, 16, 16
    Cmid, Cout = 8, 8
    x = jax.random.normal(kx, (N, Cin, H, W), jnp.float32)
    params = init_params(kp, Cin, Cmid, Cout)

    out = encoder_block(x, params)
    jax.block_until_ready(out)

    ref = reference(x, params)
    # bf16 MXU operands (f32 accumulation) -> compare at bf16-appropriate tolerance.
    np.testing.assert_allclose(np.asarray(out), np.asarray(ref),
                               rtol=2e-3, atol=2e-3)
    print("KERNEL_OK")
</pallas_src>

<mosaic_0001>
module attributes {stable_mosaic.version = 11 : i64} {
  func.func @_encoder_block_kernel(%arg0: memref<32x64xf32, #tpu.memory_space<vmem>>, %arg1: memref<3x64x128xbf16, #tpu.memory_space<vmem>>, %arg2: memref<3x128x128xbf16, #tpu.memory_space<vmem>>, %arg3: memref<1x8xf32, #tpu.memory_space<vmem>>, %arg4: memref<1x8xf32, #tpu.memory_space<vmem>>, %arg5: memref<1x8xf32, #tpu.memory_space<vmem>>, %arg6: memref<1x8xf32, #tpu.memory_space<vmem>>, %arg7: memref<128x8xf32, #tpu.memory_space<vmem>>, %arg8: memref<8x128xf32, #tpu.memory_space<vmem>>, %arg9: memref<128x8xf32, #tpu.memory_space<vmem>>, %arg10: memref<8x128xf32, #tpu.memory_space<vmem>>, %arg11: memref<1x1xf32, #tpu.memory_space<smem>>, %arg12: memref<32x128xf32, #tpu.memory_space<vmem>>) attributes {dimension_semantics = [], scalar_prefetch = 0 : i64, scratch_operands = 0 : i64, tpu.core_type = #tpu.core_type<tc>} {
    %c0 = arith.constant 0 : index
    %c0_0 = arith.constant 0 : index
    %0 = memref.load %arg11[%c0, %c0_0] : memref<1x1xf32, #tpu.memory_space<smem>>
    %1 = tpu.iota {dimensions = array<i32: 0>} : vector<32x1xi32>
    %c16_i32 = arith.constant 16 : i32
    %c0_i32 = arith.constant 0 : i32
    %2 = arith.cmpi eq, %c16_i32, %c0_i32 : i32
    %c1_i32 = arith.constant 1 : i32
    %3 = arith.select %2, %c1_i32, %c16_i32 : i32
    %4 = vector.broadcast %3 : i32 to vector<32x1xi32>
    %5 = arith.remsi %1, %4 : vector<32x1xi32>
    %c0_i32_1 = arith.constant 0 : i32
    %6 = vector.broadcast %c0_i32_1 : i32 to vector<32x1xi32>
    %7 = arith.cmpi ne, %5, %6 : vector<32x1xi32>
    %c0_i32_2 = arith.constant 0 : i32
    %8 = vector.broadcast %c0_i32_2 : i32 to vector<32x1xi32>
    %9 = arith.cmpi slt, %5, %8 : vector<32x1xi32>
    %c0_i32_3 = arith.constant 0 : i32
    %10 = arith.cmpi slt, %3, %c0_i32_3 : i32
    %11 = vector.broadcast %10 : i1 to vector<32x1xi1>
    %12 = vector.broadcast %11 : vector<32x1xi1> to vector<32x1xi1>
    %13 = arith.xori %9, %12 : vector<32x1xi1>
    %14 = arith.andi %13, %7 : vector<32x1xi1>
    %15 = vector.broadcast %3 : i32 to vector<32x1xi32>
    %16 = arith.addi %5, %15 : vector<32x1xi32>
    %17 = arith.select %14, %16, %5 : vector<32x1xi1>, vector<32x1xi32>
    %c0_i32_4 = arith.constant 0 : i32
    %18 = vector.broadcast %c0_i32_4 : i32 to vector<32x1xi32>
    %19 = arith.cmpi ne, %17, %18 : vector<32x1xi32>
    %c15_i32 = arith.constant 15 : i32
    %20 = vector.broadcast %c15_i32 : i32 to vector<32x1xi32>
    %21 = arith.cmpi ne, %17, %20 : vector<32x1xi32>
    %c0_5 = arith.constant 0 : index
    %c0_6 = arith.constant 0 : index
    %22 = vector.load %arg0[%c0_5, %c0_6] : memref<32x64xf32, #tpu.memory_space<vmem>>, vector<32x64xf32>
    %23 = arith.truncf %22 : vector<32x64xf32> to vector<32x64xbf16>
    %c1 = arith.constant 1 : index
    %c0_7 = arith.constant 0 : index
    %c0_8 = arith.constant 0 : index
    %24 = vector.load %arg1[%c1, %c0_7, %c0_8] : memref<3x64x128xbf16, #tpu.memory_space<vmem>>, vector<1x64x128xbf16>
    %25 = vector.shape_cast %24 : vector<1x64x128xbf16> to vector<64x128xbf16>
    %cst = arith.constant dense<0.000000e+00> : vector<32x128xf32>
    %26 = tpu.matmul %23, %25, %cst {dimension_numbers = #tpu.dot_dimension_numbers<[1], [0], [0], [1], [0, 0, 1, 1], [], []>} : vector<32x64xbf16>, vector<64x128xbf16>, vector<32x128xf32> -> vector<32x128xf32>
    %c1_i32_9 = arith.constant 1 : i32
    %27 = tpu.dynamic_rotate %22 by %c1_i32_9 dim 0 : vector<32x64xf32>, i32 -> vector<32x64xf32>
    %cst_10 = arith.constant 0.000000e+00 : f32
    %28 = vector.shape_cast %19 : vector<32x1xi1> to vector<32x1xi1>
    %29 = vector.broadcast %28 : vector<32x1xi1> to vector<32x64xi1>
    %30 = vector.broadcast %cst_10 : f32 to vector<32x64xf32>
    %31 = arith.select %29, %27, %30 : vector<32x64xi1>, vector<32x64xf32>
    %32 = arith.truncf %31 : vector<32x64xf32> to vector<32x64xbf16>
    %c0_11 = arith.constant 0 : index
    %c0_12 = arith.constant 0 : index
    %c0_13 = arith.constant 0 : index
    %33 = vector.load %arg1[%c0_11, %c0_12, %c0_13] : memref<3x64x128xbf16, #tpu.memory_space<vmem>>, vector<1x64x128xbf16>
    %34 = vector.shape_cast %33 : vector<1x64x128xbf16> to vector<64x128xbf16>
    %cst_14 = arith.constant dense<0.000000e+00> : vector<32x128xf32>
    %35 = tpu.matmul %32, %34, %cst_14 {dimension_numbers = #tpu.dot_dimension_numbers<[1], [0], [0], [1], [0, 0, 1, 1], [], []>} : vector<32x64xbf16>, vector<64x128xbf16>, vector<32x128xf32> -> vector<32x128xf32>
    %36 = arith.addf %26, %35 : vector<32x128xf32>
    %c31_i32 = arith.constant 31 : i32
    %37 = tpu.dynamic_rotate %22 by %c31_i32 dim 0 : vector<32x64xf32>, i32 -> vector<32x64xf32>
    %cst_15 = arith.constant 0.000000e+00 : f32
    %38 = vector.shape_cast %21 : vector<32x1xi1> to vector<32x1xi1>
    %39 = vector.broadcast %38 : vector<32x1xi1> to vector<32x64xi1>
    %40 = vector.broadcast %cst_15 : f32 to vector<32x64xf32>
    %41 = arith.select %39, %37, %40 : vector<32x64xi1>, vector<32x64xf32>
    %42 = arith.truncf %41 : vector<32x64xf32> to vector<32x64xbf16>
    %c2 = arith.constant 2 : index
    %c0_16 = arith.constant 0 : index
    %c0_17 = arith.constant 0 : index
    %43 = vector.load %arg1[%c2, %c0_16, %c0_17] : memref<3x64x128xbf16, #tpu.memory_space<vmem>>, vector<1x64x128xbf16>
    %44 = vector.shape_cast %43 : vector<1x64x128xbf16> to vector<64x128xbf16>
    %cst_18 = arith.constant dense<0.000000e+00> : vector<32x128xf32>
    %45 = tpu.matmul %42, %44, %cst_18 {dimension_numbers = #tpu.dot_dimension_numbers<[1], [0], [0], [1], [0, 0, 1, 1], [], []>} : vector<32x64xbf16>, vector<64x128xbf16>, vector<32x128xf32> -> vector<32x128xf32>
    %46 = arith.addf %36, %45 : vector<32x128xf32>
    %cst_19 = arith.constant dense<0.000000e+00> : vector<128xf32>
    %47 = vector.multi_reduction <add>, %46, %cst_19 [0] : vector<32x128xf32> to vector<128xf32>
    %48 = vector.shape_cast %47 : vector<128xf32> to vector<1x128xf32>
    %49 = arith.mulf %46, %46 : vector<32x128xf32>
    %cst_20 = arith.constant dense<0.000000e+00> : vector<128xf32>
    %50 = vector.multi_reduction <add>, %49, %cst_20 [0] : vector<32x128xf32> to vector<128xf32>
    %51 = vector.shape_cast %50 : vector<128xf32> to vector<1x128xf32>
    %52 = tpu.concatenate %48, %51 in 0 : vector<1x128xf32>, vector<1x128xf32> -> vector<2x128xf32>
    %c0_21 = arith.constant 0 : index
    %c0_22 = arith.constant 0 : index
    %53 = vector.load %arg7[%c0_21, %c0_22] : memref<128x8xf32, #tpu.memory_space<vmem>>, vector<128x8xf32>
    %cst_23 = arith.constant dense<0.000000e+00> : vector<2x8xf32>
    %54 = tpu.matmul %52, %53, %cst_23 {dimension_numbers = #tpu.dot_dimension_numbers<[1], [0], [0], [1], [0, 0, 1, 1], [], []>} : vector<2x128xf32>, vector<128x8xf32>, vector<2x8xf32> -> vector<2x8xf32>
    %cst_24 = arith.constant 0.001953125 : f32
    %55 = vector.broadcast %cst_24 : f32 to vector<2x8xf32>
    %56 = arith.mulf %54, %55 : vector<2x8xf32>
    %57 = vector.extract_strided_slice %56 {offsets = [0, 0], sizes = [1, 8], strides = [1, 1]} : vector<2x8xf32> to vector<1x8xf32>
    %58 = vector.extract_strided_slice %56 {offsets = [1, 0], sizes = [1, 8], strides = [1, 1]} : vector<2x8xf32> to vector<1x8xf32>
    %59 = arith.mulf %57, %57 : vector<1x8xf32>
    %60 = arith.subf %58, %59 : vector<1x8xf32>
    %c0_25 = arith.constant 0 : index
    %c0_26 = arith.constant 0 : index
    %61 = vector.load %arg3[%c0_25, %c0_26] : memref<1x8xf32, #tpu.memory_space<vmem>>, vector<1x8xf32>
    %cst_27 = arith.constant 9.99999974E-6 : f32
    %62 = vector.broadcast %cst_27 : f32 to vector<1x8xf32>
    %63 = arith.addf %60, %62 : vector<1x8xf32>
    %64 = math.rsqrt %63 : vector<1x8xf32>
    %65 = arith.mulf %61, %64 : vector<1x8xf32>
    %c0_28 = arith.constant 0 : index
    %c0_29 = arith.constant 0 : index
    %66 = vector.load %arg4[%c0_28, %c0_29] : memref<1x8xf32, #tpu.memory_space<vmem>>, vector<1x8xf32>
    %67 = arith.mulf %57, %65 : vector<1x8xf32>
    %68 = arith.subf %66, %67 : vector<1x8xf32>
    %69 = tpu.concatenate %65, %68 in 0 : vector<1x8xf32>, vector<1x8xf32> -> vector<2x8xf32>
    %c0_30 = arith.constant 0 : index
    %c0_31 = arith.constant 0 : index
    %70 = vector.load %arg8[%c0_30, %c0_31] : memref<8x128xf32, #tpu.memory_space<vmem>>, vector<8x128xf32>
    %cst_32 = arith.constant dense<0.000000e+00> : vector<2x128xf32>
    %71 = tpu.matmul %69, %70, %cst_32 {dimension_numbers = #tpu.dot_dimension_numbers<[1], [0], [0], [1], [0, 0, 1, 1], [], []>} : vector<2x8xf32>, vector<8x128xf32>, vector<2x128xf32> -> vector<2x128xf32>
    %72 = vector.extract_strided_slice %71 {offsets = [0, 0], sizes = [1, 128], strides = [1, 1]} : vector<2x128xf32> to vector<1x128xf32>
    %73 = vector.broadcast %72 : vector<1x128xf32> to vector<32x128xf32>
    %74 = arith.mulf %46, %73 : vector<32x128xf32>
    %75 = vector.extract_strided_slice %71 {offsets = [1, 0], sizes = [1, 128], strides = [1, 1]} : vector<2x128xf32> to vector<1x128xf32>
    %76 = vector.broadcast %75 : vector<1x128xf32> to vector<32x128xf32>
    %77 = arith.addf %74, %76 : vector<32x128xf32>
    %cst_33 = arith.constant 0.000000e+00 : f32
    %78 = vector.broadcast %cst_33 : f32 to vector<32x128xf32>
    %79 = arith.cmpf oge, %77, %78 : vector<32x128xf32>
    %80 = vector.broadcast %0 : f32 to vector<32x128xf32>
    %81 = arith.mulf %80, %77 : vector<32x128xf32>
    %82 = arith.select %79, %77, %81 : vector<32x128xi1>, vector<32x128xf32>
    %83 = arith.truncf %82 : vector<32x128xf32> to vector<32x128xbf16>
    %c1_34 = arith.constant 1 : index
    %c0_35 = arith.constant 0 : index
    %c0_36 = arith.constant 0 : index
    %84 = vector.load %arg2[%c1_34, %c0_35, %c0_36] : memref<3x128x128xbf16, #tpu.memory_space<vmem>>, vector<1x128x128xbf16>
    %85 = vector.shape_cast %84 : vector<1x128x128xbf16> to vector<128x128xbf16>
    %cst_37 = arith.constant dense<0.000000e+00> : vector<32x128xf32>
    %86 = tpu.matmul %83, %85, %cst_37 {dimension_numbers = #tpu.dot_dimension_numbers<[1], [0], [0], [1], [0, 0, 1, 1], [], []>} : vector<32x128xbf16>, vector<128x128xbf16>, vector<32x128xf32> -> vector<32x128xf32>
    %c1_i32_38 = arith.constant 1 : i32
    %87 = tpu.dynamic_rotate %82 by %c1_i32_38 dim 0 : vector<32x128xf32>, i32 -> vector<32x128xf32>
    %cst_39 = arith.constant 0.000000e+00 : f32
    %88 = vector.shape_cast %19 : vector<32x1xi1> to vector<32x1xi1>
    %89 = vector.broadcast %88 : vector<32x1xi1> to vector<32x128xi1>
    %90 = vector.broadcast %cst_39 : f32 to vector<32x128xf32>
    %91 = arith.select %89, %87, %90 : vector<32x128xi1>, vector<32x128xf32>
    %92 = arith.truncf %91 : vector<32x128xf32> to vector<32x128xbf16>
    %c0_40 = arith.constant 0 : index
    %c0_41 = arith.constant 0 : index
    %c0_42 = arith.constant 0 : index
    %93 = vector.load %arg2[%c0_40, %c0_41, %c0_42] : memref<3x128x128xbf16, #tpu.memory_space<vmem>>, vector<1x128x128xbf16>
    %94 = vector.shape_cast %93 : vector<1x128x128xbf16> to vector<128x128xbf16>
    %cst_43 = arith.constant dense<0.000000e+00> : vector<32x128xf32>
    %95 = tpu.matmul %92, %94, %cst_43 {dimension_numbers = #tpu.dot_dimension_numbers<[1], [0], [0], [1], [0, 0, 1, 1], [], []>} : vector<32x128xbf16>, vector<128x128xbf16>, vector<32x128xf32> -> vector<32x128xf32>
    %96 = arith.addf %86, %95 : vector<32x128xf32>
    %c31_i32_44 = arith.constant 31 : i32
    %97 = tpu.dynamic_rotate %82 by %c31_i32_44 dim 0 : vector<32x128xf32>, i32 -> vector<32x128xf32>
    %cst_45 = arith.constant 0.000000e+00 : f32
    %98 = vector.shape_cast %21 : vector<32x1xi1> to vector<32x1xi1>
    %99 = vector.broadcast %98 : vector<32x1xi1> to vector<32x128xi1>
    %100 = vector.broadcast %cst_45 : f32 to vector<32x128xf32>
    %101 = arith.select %99, %97, %100 : vector<32x128xi1>, vector<32x128xf32>
    %102 = arith.truncf %101 : vector<32x128xf32> to vector<32x128xbf16>
    %c2_46 = arith.constant 2 : index
    %c0_47 = arith.constant 0 : index
    %c0_48 = arith.constant 0 : index
    %103 = vector.load %arg2[%c2_46, %c0_47, %c0_48] : memref<3x128x128xbf16, #tpu.memory_space<vmem>>, vector<1x128x128xbf16>
    %104 = vector.shape_cast %103 : vector<1x128x128xbf16> to vector<128x128xbf16>
    %cst_49 = arith.constant dense<0.000000e+00> : vector<32x128xf32>
    %105 = tpu.matmul %102, %104, %cst_49 {dimension_numbers = #tpu.dot_dimension_numbers<[1], [0], [0], [1], [0, 0, 1, 1], [], []>} : vector<32x128xbf16>, vector<128x128xbf16>, vector<32x128xf32> -> vector<32x128xf32>
    %106 = arith.addf %96, %105 : vector<32x128xf32>
    %cst_50 = arith.constant dense<0.000000e+00> : vector<128xf32>
    %107 = vector.multi_reduction <add>, %106, %cst_50 [0] : vector<32x128xf32> to vector<128xf32>
    %108 = vector.shape_cast %107 : vector<128xf32> to vector<1x128xf32>
    %109 = arith.mulf %106, %106 : vector<32x128xf32>
    %cst_51 = arith.constant dense<0.000000e+00> : vector<128xf32>
    %110 = vector.multi_reduction <add>, %109, %cst_51 [0] : vector<32x128xf32> to vector<128xf32>
    %111 = vector.shape_cast %110 : vector<128xf32> to vector<1x128xf32>
    %112 = tpu.concatenate %108, %111 in 0 : vector<1x128xf32>, vector<1x128xf32> -> vector<2x128xf32>
    %c0_52 = arith.constant 0 : index
    %c0_53 = arith.constant 0 : index
    %113 = vector.load %arg9[%c0_52, %c0_53] : memref<128x8xf32, #tpu.memory_space<vmem>>, vector<128x8xf32>
    %cst_54 = arith.constant dense<0.000000e+00> : vector<2x8xf32>
    %114 = tpu.matmul %112, %113, %cst_54 {dimension_numbers = #tpu.dot_dimension_numbers<[1], [0], [0], [1], [0, 0, 1, 1], [], []>} : vector<2x128xf32>, vector<128x8xf32>, vector<2x8xf32> -> vector<2x8xf32>
    %cst_55 = arith.constant 0.001953125 : f32
    %115 = vector.broadcast %cst_55 : f32 to vector<2x8xf32>
    %116 = arith.mulf %114, %115 : vector<2x8xf32>
    %117 = vector.extract_strided_slice %116 {offsets = [0, 0], sizes = [1, 8], strides = [1, 1]} : vector<2x8xf32> to vector<1x8xf32>
    %118 = vector.extract_strided_slice %116 {offsets = [1, 0], sizes = [1, 8], strides = [1, 1]} : vector<2x8xf32> to vector<1x8xf32>
    %119 = arith.mulf %117, %117 : vector<1x8xf32>
    %120 = arith.subf %118, %119 : vector<1x8xf32>
    %c0_56 = arith.constant 0 : index
    %c0_57 = arith.constant 0 : index
    %121 = vector.load %arg5[%c0_56, %c0_57] : memref<1x8xf32, #tpu.memory_space<vmem>>, vector<1x8xf32>
    %cst_58 = arith.constant 9.99999974E-6 : f32
    %122 = vector.broadcast %cst_58 : f32 to vector<1x8xf32>
    %123 = arith.addf %120, %122 : vector<1x8xf32>
    %124 = math.rsqrt %123 : vector<1x8xf32>
    %125 = arith.mulf %121, %124 : vector<1x8xf32>
    %c0_59 = arith.constant 0 : index
    %c0_60 = arith.constant 0 : index
    %126 = vector.load %arg6[%c0_59, %c0_60] : memref<1x8xf32, #tpu.memory_space<vmem>>, vector<1x8xf32>
    %127 = arith.mulf %117, %125 : vector<1x8xf32>
    %128 = arith.subf %126, %127 : vector<1x8xf32>
    %129 = tpu.concatenate %125, %128 in 0 : vector<1x8xf32>, vector<1x8xf32> -> vector<2x8xf32>
    %c0_61 = arith.constant 0 : index
    %c0_62 = arith.constant 0 : index
    %130 = vector.load %arg10[%c0_61, %c0_62] : memref<8x128xf32, #tpu.memory_space<vmem>>, vector<8x128xf32>
    %cst_63 = arith.constant dense<0.000000e+00> : vector<2x128xf32>
    %131 = tpu.matmul %129, %130, %cst_63 {dimension_numbers = #tpu.dot_dimension_numbers<[1], [0], [0], [1], [0, 0, 1, 1], [], []>} : vector<2x8xf32>, vector<8x128xf32>, vector<2x128xf32> -> vector<2x128xf32>
    %132 = vector.extract_strided_slice %131 {offsets = [0, 0], sizes = [1, 128], strides = [1, 1]} : vector<2x128xf32> to vector<1x128xf32>
    %133 = vector.broadcast %132 : vector<1x128xf32> to vector<32x128xf32>
    %134 = arith.mulf %106, %133 : vector<32x128xf32>
    %135 = vector.extract_strided_slice %131 {offsets = [1, 0], sizes = [1, 128], strides = [1, 1]} : vector<2x128xf32> to vector<1x128xf32>
    %136 = vector.broadcast %135 : vector<1x128xf32> to vector<32x128xf32>
    %137 = arith.addf %134, %136 : vector<32x128xf32>
    %cst_64 = arith.constant 0.000000e+00 : f32
    %138 = vector.broadcast %cst_64 : f32 to vector<32x128xf32>
    %139 = arith.cmpf oge, %137, %138 : vector<32x128xf32>
    %140 = vector.broadcast %0 : f32 to vector<32x128xf32>
    %141 = arith.mulf %140, %137 : vector<32x128xf32>
    %142 = arith.select %139, %137, %141 : vector<32x128xi1>, vector<32x128xf32>
    %c0_65 = arith.constant 0 : index
    %c0_66 = arith.constant 0 : index
    %143 = vector.load %arg12[%c0_65, %c0_66] : memref<32x128xf32, #tpu.memory_space<vmem>>, vector<32x128xf32>
    tpu.vector_store %arg12[%c0_65, %c0_66], %142 {strides = array<i32>} : memref<32x128xf32, #tpu.memory_space<vmem>>, vector<32x128xf32>,
    return
  }
}

</mosaic_0001>

<bundles_post_ra>
// kernel: tile.14
= control target key start
LH: loop header
LB: loop body
LE: loop exit
PB: predicated region body
PF: predicated region fallthrough
CT: control target
= control target key end

     0   :  { %vm6_vm0 = vcmask 1043458   ;;  %vm10_vm1 = vcmask 1045508   ;;  %vm14_vm2 = vcmask 1047558   ;;  %s19_s6 = smov 3  ;;  %s22_s7 = smov 12  ;;  %vm16_vm3 = vcmask 64512   ;;  %s736_s0 = inlined_call_operand.vmem [shape: f32[16,8,8], index: 0, kind: input, shape index: {}]   ;;  %s737_s1 = inlined_call_operand.vmem [shape: f32[128,8], index: 1, kind: output, shape index: {}]  }
   0x1   :  { %v348_v0 = vld [vmem:[%s736_s0 + $0xf] ss:$16 sm:%s19_s6]   ;;  %s27_s12 = smov 48  ;;  %s32_s13 = smov 192  ;;  %vm38_vm4 = vcmask 1048512   ;;  %vm60_vm5 = vcmask 982912  }
   0x2   :  { %v349_v1 = vld [vmem:[%s736_s0 + $0xf] ss:$16 sm:%s22_s7]   ;;  %s63_s18 = smov 3  ;;  %s66_s21 = smov 12  ;;  %vm82_vm6 = vcmask 917312   ;;  %vm104_vm7 = vcmask 851712  }
   0x3   :  { %v25_v2 = vsel %vm6_vm0, %v349_v1, %v348_v0  ;;  %v350_v3 = vld [vmem:[%s736_s0 + $0xf] ss:$16 sm:%s27_s12]   ;;  %v356_v6 = vld [vmem:[%s736_s0 + $0xd] ss:$16 sm:%s63_s18]   ;;  %s71_s22 = smov 48  ;;  %s76_s27 = smov 192 }
   0x4   :  { %v351_v4 = vld [vmem:[%s736_s0 + $0xf] ss:$16 sm:%s32_s13]   ;;  %v30_v5 = vsel %vm10_vm1, %v350_v3, %v25_v2  ;;  %v357_v8 = vld [vmem:[%s736_s0 + $0xd] ss:$16 sm:%s66_s21]   ;;  %s423_s28 = smov 120   ;;  %s41_s2 = smov 3 }
   0x5   :  { %v35_v7 = vsel %vm14_vm2, %v351_v4, %v30_v5  ;;  %v358_v9 = vld [vmem:[%s736_s0 + $0xd] ss:$16 sm:%s71_s22]   ;;  %v69_v10 = vsel %vm6_vm0, %v357_v8, %v356_v6  ;;  %s44_s3 = smov 12  ;;  %v352_v13 = vld [vmem:[%s736_s0 + $0xe] ss:$16 sm:%s41_s2]   ;;  %s49_s8 = smov 48 }
   0x6   :  { %36 = vrot.lane.b32.xlu0 %v35_v7, %s423_s28  ;;  %v359_v11 = vld [vmem:[%s736_s0 + $0xd] ss:$16 sm:%s76_s27]   ;;  %v74_v12 = vsel %vm10_vm1, %v358_v9, %v69_v10  ;;  %s54_s9 = smov 192  ;;  %s85_s14 = smov 3  ;;  %vm126_vm8 = vcmask 786112   ;;  %vm148_vm9 = vcmask 720512  }
   0x7   :  { %v353_v14 = vld [vmem:[%s736_s0 + $0xe] ss:$16 sm:%s44_s3]   ;;  %v79_v15 = vsel %vm14_vm2, %v359_v11, %v74_v12  ;;  %s424_s15 = smov 104   ;;  %v360_v20 = vld [vmem:[%s736_s0 + $0xc] ss:$16 sm:%s85_s14]   ;;  %s88_s18 = smov 12 }
   0x8   :  { %v47_v16 = vsel %vm6_vm0, %v353_v14, %v352_v13  ;;  %v354_v17 = vld [vmem:[%s736_s0 + $0xe] ss:$16 sm:%s49_s8]   ;;  %80 = vrot.lane.b32.xlu1 %v79_v15, %s424_s15  ;;  %s93_s19 = smov 48  ;;  %s98_s24 = smov 192  ;;  %vm170_vm10 = vcmask 654912   ;;  %vm192_vm11 = vcmask 589312  }
   0x9   :  { %v355_v18 = vld [vmem:[%s736_s0 + $0xe] ss:$16 sm:%s54_s9]   ;;  %v52_v19 = vsel %vm10_vm1, %v354_v17, %v47_v16  ;;  %v361_v21 = vld [vmem:[%s736_s0 + $0xc] ss:$16 sm:%s88_s18]   ;;  %s151_s27 = smov 3  ;;  %s154_s28 = smov 12 }
   0xa   :  { %v362_v22 = vld [vmem:[%s736_s0 + $0xc] ss:$16 sm:%s93_s19]   ;;  %v57_v23 = vsel %vm14_vm2, %v355_v18, %v52_v19  ;;  %v91_v24 = vsel %vm6_vm0, %v361_v21, %v360_v20  ;;  %v372_v27 = vld [vmem:[%s736_s0 + $0x9] ss:$16 sm:%s151_s27]   ;;  %s159_s4 = smov 48  ;;  %s164_s7 = smov 192 }
   0xb   :  { %v363_v25 = vld [vmem:[%s736_s0 + $0xc] ss:$16 sm:%s98_s24]   ;;  %v96_v26 = vsel %vm10_vm1, %v362_v22, %v91_v24  ;;  %v373_v28 = vld [vmem:[%s736_s0 + $0x9] ss:$16 sm:%s154_s28]   ;;  %s173_s8 = smov 3  ;;  %s425_s9 = smov 112  }
   0xc   :  { %v157_v29 = vsel %vm6_vm0, %v373_v28, %v372_v27  ;;  %v374_v30 = vld [vmem:[%s736_s0 + $0x9] ss:$16 sm:%s159_s4]   ;;  %v101_v31 = vsel %vm14_vm2, %v363_v25, %v96_v26  ;;  %v376_v32 = vld [vmem:[%s736_s0 + $0x8] ss:$16 sm:%s173_s8]   ;;  %s176_s12 = smov 12  ;;  %s181_s13 = smov 48 }
   0xd   :  { %v377_v33 = vld [vmem:[%s736_s0 + $0x8] ss:$16 sm:%s176_s12]   ;;  %s186_s16 = smov 192  ;;  %v162_v34 = vsel %vm10_vm1, %v374_v30, %v157_v29  ;;  %v375_v35 = vld [vmem:[%s736_s0 + $0x9] ss:$16 sm:%s164_s7]   ;;  %s217_s21 = smov 3 }
   0xe   :  { %58 = vrot.lane.b32.xlu0 %v57_v23, %s425_s9  ;;  %v179_v36 = vsel %vm6_vm0, %v377_v33, %v376_v32  ;;  %v378_v37 = vld [vmem:[%s736_s0 + $0x8] ss:$16 sm:%s181_s13]   ;;  %s220_s22 = smov 12  ;;  %s426_s23 = smov 96   ;;  %v167_v40 = vsel %vm14_vm2, %v375_v35, %v162_v34  ;;  %vm214_vm12 = vcmask 523712   ;;  %vm236_vm13 = vcmask 458112  }
   0xf   :  { %s225_s24 = smov 48  ;;  %v384_v38 = vld [vmem:[%s736_s0 + $0x6] ss:$16 sm:%s217_s21]   ;;  %s239_s29 = smov 3  ;;  %v184_v41 = vsel %vm10_vm1, %v378_v37, %v179_v36  ;;  %v379_v42 = vld [vmem:[%s736_s0 + $0x8] ss:$16 sm:%s186_s16]  }
  0x10   :  { %102 = vrot.lane.b32.xlu1 %v101_v31, %s426_s23  ;;  %v385_v39 = vld [vmem:[%s736_s0 + $0x6] ss:$16 sm:%s220_s22]   ;;  %s230_s3 = smov 192  ;;  %s242_s4 = smov 12  ;;  %v189_v47 = vsel %vm14_vm2, %v379_v42, %v184_v41  ;;  %vm258_vm14 = vcmask 392512   ;;  %vm280_vm15 = vcmask 326912  }
  0x11   :  { %v386_v43 = vld [vmem:[%s736_s0 + $0x6] ss:$16 sm:%s225_s24]   ;;  %s247_s7 = smov 48  ;;  %v223_v44 = vsel %vm6_vm0, %v385_v39, %v384_v38  ;;  %v388_v45 = vld [vmem:[%s736_s0 + $0x5] ss:$16 sm:%s239_s29]   ;;  %s107_s12 = smov 3 }
  0x12   :  { %v389_v46 = vld [vmem:[%s736_s0 + $0x5] ss:$16 sm:%s242_s4]   ;;  %s110_s13 = smov 12  ;;  %s427_s14 = smov 72   ;;  %v387_v48 = vld [vmem:[%s736_s0 + $0x6] ss:$16 sm:%s230_s3]   ;;  %v228_v52 = vsel %vm10_vm1, %v386_v43, %v223_v44 }
  0x13   :  { %v364_v49 = vld [vmem:[%s736_s0 + $0xb] ss:$16 sm:%s107_s12]   ;;  %s115_s19 = smov 48  ;;  %s120_s20 = smov 192  ;;  %v245_v53 = vsel %vm6_vm0, %v389_v46, %v388_v45  ;;  %v390_v54 = vld [vmem:[%s736_s0 + $0x5] ss:$16 sm:%s247_s7]   ;;  %v233_v61 = vsel %vm14_vm2, %v387_v48, %v228_v52 }
  0x14   :  { %s252_s21 = smov 192  ;;  %v365_v50 = vld [vmem:[%s736_s0 + $0xb] ss:$16 sm:%s110_s13]   ;;  %s283_s26 = smov 3  ;;  %v250_v62 = vsel %vm10_vm1, %v390_v54, %v245_v53 }
  0x15   :  { %v366_v51 = vld [vmem:[%s736_s0 + $0xb] ss:$16 sm:%s115_s19]   ;;  %v113_v55 = vsel %vm6_vm0, %v365_v50, %v364_v49  ;;  %s286_s2 = smov 12  ;;  %s428_s3 = smov 64   ;;  %v396_v59 = vld [vmem:[%s736_s0 + $0x3] ss:$16 sm:%s283_s26]  }
  0x16   :  { %168 = vrot.lane.b32.xlu0 %v167_v40, %s427_s14  ;;  %v367_v56 = vld [vmem:[%s736_s0 + $0xb] ss:$16 sm:%s120_s20]   ;;  %v118_v57 = vsel %vm10_vm1, %v366_v51, %v113_v55  ;;  %s291_s4 = smov 48  ;;  %s305_s9 = smov 3 }
  0x17   :  { %v123_v58 = vsel %vm14_vm2, %v367_v56, %v118_v57  ;;  %v397_v60 = vld [vmem:[%s736_s0 + $0x3] ss:$16 sm:%s286_s2]   ;;  %s308_s10 = smov 12  ;;  %v391_v63 = vld [vmem:[%s736_s0 + $0x5] ss:$16 sm:%s252_s21]   ;;  %s429_s13 = smov 88  }
  0x18   :  { %190 = vrot.lane.b32.xlu1 %v189_v47, %s428_s3  ;;  %124 = vrot.lane.b32.xlu2 %v123_v58, %s429_s13  ;;  %s296_s14 = smov 192  ;;  %s313_s15 = smov 48  ;;  %v398_v0 = vld [vmem:[%s736_s0 + $0x3] ss:$16 sm:%s291_s4]   ;;  %v289_v2 = vsel %vm6_vm0, %v397_v60, %v396_v59  ;;  %v255_v5 = vsel %vm14_vm2, %v391_v63, %v250_v62 }
  0x19   :  { %v400_v1 = vld [vmem:[%s736_s0 + $0x2] ss:$16 sm:%s305_s9]   ;;  %s129_s20 = smov 3  ;;  %s132_s25 = smov 12  ;;  %v399_v6 = vld [vmem:[%s736_s0 + $0x3] ss:$16 sm:%s296_s14]   ;;  %v294_v12 = vsel %vm10_vm1, %v398_v0, %v289_v2 }
  0x1a   :  { %v401_v3 = vld [vmem:[%s736_s0 + $0x2] ss:$16 sm:%s308_s10]   ;;  %v368_v4 = vld [vmem:[%s736_s0 + $0xa] ss:$16 sm:%s129_s20]   ;;  %s137_s26 = smov 48  ;;  %s430_s27 = smov 48   ;;  %v299_v20 = vsel %vm14_vm2, %v399_v6, %v294_v12 }
  0x1b   :  { %v402_v7 = vld [vmem:[%s736_s0 + $0x2] ss:$16 sm:%s313_s15]   ;;  %s318_s3 = smov 192  ;;  %v369_v8 = vld [vmem:[%s736_s0 + $0xa] ss:$16 sm:%s132_s25]   ;;  %s142_s6 = smov 192  ;;  %v311_v13 = vsel %vm6_vm0, %v401_v3, %v400_v1 }
  0x1c   :  { %v135_v9 = vsel %vm6_vm0, %v369_v8, %v368_v4  ;;  %v370_v10 = vld [vmem:[%s736_s0 + $0xa] ss:$16 sm:%s137_s26]   ;;  %s195_s11 = smov 3  ;;  %s198_s12 = smov 12  ;;  %v316_v21 = vsel %vm10_vm1, %v402_v7, %v311_v13  ;;  %v403_v22 = vld [vmem:[%s736_s0 + $0x2] ss:$16 sm:%s318_s3]  }
  0x1d   :  { %v371_v11 = vld [vmem:[%s736_s0 + $0xa] ss:$16 sm:%s142_s6]   ;;  %v140_v14 = vsel %vm10_vm1, %v370_v10, %v135_v9  ;;  %v380_v15 = vld [vmem:[%s736_s0 + $0x7] ss:$16 sm:%s195_s11]   ;;  %s203_s17 = smov 48  ;;  %s431_s18 = smov 40   ;;  %v321_v25 = vsel %vm14_vm2, %v403_v22, %v316_v21 }
  0x1e   :  { %234 = vrot.lane.b32.xlu0 %v233_v61, %s430_s27  ;;  %v381_v16 = vld [vmem:[%s736_s0 + $0x7] ss:$16 sm:%s198_s12]   ;;  %v145_v17 = vsel %vm14_vm2, %v371_v11, %v140_v14  ;;  %s208_s21 = smov 192  ;;  %s432_s24 = smov 80  }
  0x1f   :  { %v201_v18 = vsel %vm6_vm0, %v381_v16, %v380_v15  ;;  %v382_v19 = vld [vmem:[%s736_s0 + $0x7] ss:$16 sm:%s203_s17]   ;;  %s261_s25 = smov 3  ;;  %s264_s26 = smov 12 }
  0x20   :  { %256 = vrot.lane.b32.xlu1 %v255_v5, %s431_s18  ;;  %146 = vrot.lane.b32.xlu2 %v145_v17, %s432_s24  ;;  %v206_v23 = vsel %vm10_vm1, %v382_v19, %v201_v18  ;;  %v383_v24 = vld [vmem:[%s736_s0 + $0x7] ss:$16 sm:%s208_s21]   ;;  %s433_s29 = smov 24   ;;  %s269_s5 = smov 48 }
  0x21   :  { %v392_v26 = vld [vmem:[%s736_s0 + $0x4] ss:$16 sm:%s261_s25]   ;;  %v211_v28 = vsel %vm14_vm2, %v383_v24, %v206_v23  ;;  %s434_s6 = smov 16   ;;  %s274_s9 = smov 192 }
  0x22   :  { %v393_v27 = vld [vmem:[%s736_s0 + $0x4] ss:$16 sm:%s264_s26]   ;;  %s435_s10 = smov 56   ;;  %s327_s11 = smov 3 }
  0x23   :  { %v267_v29 = vsel %vm6_vm0, %v393_v27, %v392_v26  ;;  %v394_v30 = vld [vmem:[%s736_s0 + $0x4] ss:$16 sm:%s269_s5]   ;;  %s330_s12 = smov 12  ;;  %v404_v33 = vld [vmem:[%s736_s0 + $0x1] ss:$16 sm:%s327_s11]   ;;  %s335_s19 = smov 48 }
  0x24   :  { %v272_v31 = vsel %vm10_vm1, %v394_v30, %v267_v29  ;;  %v395_v32 = vld [vmem:[%s736_s0 + $0x4] ss:$16 sm:%s274_s9]   ;;  %v405_v34 = vld [vmem:[%s736_s0 + $0x1] ss:$16 sm:%s330_s12]   ;;  %s340_s22 = smov 192  ;;  %s436_s23 = smov 32  }
  0x25   :  { %v277_v35 = vsel %vm14_vm2, %v395_v32, %v272_v31  ;;  %v333_v36 = vsel %vm6_vm0, %v405_v34, %v404_v33  ;;  %v406_v37 = vld [vmem:[%s736_s0 + $0x1] ss:$16 sm:%s335_s19]   ;;  %s437_s26 = smov 8   ;;  %s2_s27 = smov 3 }
  0x26   :  { %300 = vrot.lane.b32.xlu0 %v299_v20, %s433_s29  ;;  %v338_v38 = vsel %vm10_vm1, %v406_v37, %v333_v36  ;;  %v407_v39 = vld [vmem:[%s736_s0 + $0x1] ss:$16 sm:%s340_s22]   ;;  %s4_s28 = smov 12  ;;  %s8_s29 = smov 48 }
  0x27   :  { %v343_v40 = vsel %vm14_vm2, %v407_v39, %v338_v38  ;;  %s12_s30 = smov 192  ;;  %v3_v41 = vld [vmem:[%s736_s0] ss:$16 sm:%s2_s27]  }
  0x28   :  { %322 = vrot.lane.b32.xlu1 %v321_v25, %s434_s6  ;;  %212 = vrot.lane.b32.xlu2 %v211_v28, %s435_s10  ;;  %v5_v42 = vld [vmem:[%s736_s0] ss:$16 sm:%s4_s28]  }
  0x29   :  { %v7_v43 = vsel %vm6_vm0, %v5_v42, %v3_v41  ;;  %v9_v44 = vld [vmem:[%s736_s0] ss:$16 sm:%s8_s29]   ;;  %vm302_vm0 = vcmask 261312  }
  0x2a   :  { %v11_v45 = vsel %vm10_vm1, %v9_v44, %v7_v43  ;;  %v13_v46 = vld [vmem:[%s736_s0] ss:$16 sm:%s12_s30]   ;;  %vm324_vm1 = vcmask 195712  }
  0x2b   :  { %v15_v47 = vsel %vm14_vm2, %v13_v46, %v11_v45  ;;  %vm346_vm2 = vcmask 130112  }
  0x2c   :  { %17 = vst.msk [vmem:[%s737_s1] sm:$0xff] %vm16_vm3, %v15_v47  }
  0x30   :  { %278 = vrot.lane.b32.xlu2 %v277_v35, %s436_s23 }
  0x38   :  { %344 = vrot.lane.b32.xlu2 %v343_v40, %s437_s26 }
  0x72   :  { %v125_v48 = vpop.permute.xlu2 %124  }
  0x78   :  { %v37_v49 = vpop.permute.xlu0 %36  }
  0x79   :  { %39 = vst.msk [vmem:[%s737_s1] sm:$0xff] %vm38_vm4, %v37_v49  }
  0x7a   :  { %v81_v50 = vpop.permute.xlu1 %80   ;;  %v147_v51 = vpop.permute.xlu2 %146  }
  0x80   :  { %v59_v52 = vpop.permute.xlu0 %58  }
  0x81   :  { %61 = vst.msk [vmem:[%s737_s1] sm:$0xff] %vm60_vm5, %v59_v52  }
  0x82   :  { %83 = vst.msk [vmem:[%s737_s1] sm:$0xff] %vm82_vm6, %v81_v50   ;;  %v103_v53 = vpop.permute.xlu1 %102   ;;  %v213_v54 = vpop.permute.xlu2 %212  }
  0x83   :  { %105 = vst.msk [vmem:[%s737_s1] sm:$0xff] %vm104_vm7, %v103_v53  }
  0x84   :  { %127 = vst.msk [vmem:[%s737_s1] sm:$0xff] %vm126_vm8, %v125_v48  }
  0x85   :  { %149 = vst.msk [vmem:[%s737_s1] sm:$0xff] %vm148_vm9, %v147_v51  }
  0x88   :  { %v169_v55 = vpop.permute.xlu0 %168  }
  0x89   :  { %171 = vst.msk [vmem:[%s737_s1] sm:$0xff] %vm170_vm10, %v169_v55  }
  0x8a   :  { %v191_v56 = vpop.permute.xlu1 %190   ;;  %v279_v57 = vpop.permute.xlu2 %278  }
  0x8b   :  { %193 = vst.msk [vmem:[%s737_s1] sm:$0xff] %vm192_vm11, %v191_v56  }
  0x8c   :  { %215 = vst.msk [vmem:[%s737_s1] sm:$0xff] %vm214_vm12, %v213_v54  }
  0x90   :  { %v235_v58 = vpop.permute.xlu0 %234  }
  0x91   :  { %237 = vst.msk [vmem:[%s737_s1] sm:$0xff] %vm236_vm13, %v235_v58  }
  0x92   :  { %v257_v59 = vpop.permute.xlu1 %256   ;;  %v345_v60 = vpop.permute.xlu2 %344  }
  0x93   :  { %259 = vst.msk [vmem:[%s737_s1] sm:$0xff] %vm258_vm14, %v257_v59  }
  0x94   :  { %281 = vst.msk [vmem:[%s737_s1] sm:$0xff] %vm280_vm15, %v279_v57  }
  0x98   :  { %v301_v61 = vpop.permute.xlu0 %300  }
  0x99   :  { %303 = vst.msk [vmem:[%s737_s1] sm:$0xff] %vm302_vm0, %v301_v61  }
  0x9a   :  { %v323_v62 = vpop.permute.xlu1 %322  }
  0x9b   :  { %325 = vst.msk [vmem:[%s737_s1] sm:$0xff] %vm324_vm1, %v323_v62  }
  0x9c   :  { %347 = vst.msk [vmem:[%s737_s1] sm:$0xff] %vm346_vm2, %v345_v60  }

// kernel: encoder_block.1
= control target key start
LH: loop header
LB: loop body
LE: loop exit
PB: predicated region body
PF: predicated region fallthrough
CT: control target
= control target key end

     0   :  { %v44_v0 = vlaneseq  ;;  %vm175_vm4 = vcmask 523264   ;;  %vm357_vm7 = vcmask 1040384   ;;  %vm427_vm11 = vcmask 64512   ;;  %s1611_s1 = inlined_call_operand.vmem [shape: bf16[3,64,128], index: 1, kind: input, shape index: {}]   ;;  %s1612_s0 = inlined_call_operand.vmem [shape: f32[32,64], index: 0, kind: input, shape index: {}]   ;;  %s1613_s7 = inlined_call_operand.vmem [shape: f32[128,8], index: 7, kind: input, shape index: {}, may-alias: {7,9}]   ;;  %s1614_s8 = inlined_call_operand.vmem [shape: f32[8,128], index: 8, kind: input, shape index: {}, may-alias: {8,10}]   ;;  %s1615_s2 = inlined_call_operand.vmem [shape: bf16[3,128,128], index: 2, kind: input, shape index: {}]   ;;  %s1616_s3 = inlined_call_operand.vmem [shape: f32[1,8], index: 3, kind: input, shape index: {}]   ;;  %s1617_s4 = inlined_call_operand.vmem [shape: f32[1,8], index: 4, kind: input, shape index: {}]   ;;  %s1618_s11 = inlined_call_operand.<no memory space> [shape: f32[1,1], index: 11, kind: input, shape index: {}]   ;;  %s1619_s9 = inlined_call_operand.vmem [shape: f32[128,8], index: 9, kind: input, shape index: {}, may-alias: {7,9}]   ;;  %s1620_s10 = inlined_call_operand.vmem [shape: f32[8,128], index: 10, kind: input, shape index: {}, may-alias: {8,10}]   ;;  %s1621_s5 = inlined_call_operand.vmem [shape: f32[1,8], index: 5, kind: input, shape index: {}]   ;;  %s1622_s6 = inlined_call_operand.vmem [shape: f32[1,8], index: 6, kind: input, shape index: {}]   ;;  %s1623_s12 = inlined_call_operand.vmem [shape: f32[32,128], index: 12, kind: output, shape index: {}]  }
   0x1   :  { %v1122_v1 = vld [vmem:[%s1611_s1 + $0x18] sm:$0xff]  ;;  %v1121_v5 = vld [vmem:[%s1611_s1 + $0x10] sm:$0xff]  ;;  %v105_v10 = vld [vmem:[%s1612_s0] sm:$0xff] }
   0x2   :  { %v1118_v2 = vld [vmem:[%s1611_s1 + $0x38] sm:$0xff]  ;;  %v1231_v4 = vshrl.u32 %v44_v0, 7  ;;  %186 = vmatpush.bf16.msra.mxu0 %v1122_v1  ;;  %v1117_v6 = vld [vmem:[%s1611_s1 + $0x30] sm:$0xff]  ;;  %v106_v11 = vld [vmem:[%s1612_s0 + $0x8] sm:$0xff]  ;;  %v120_v13 = vrot.slane %v105_v10, 7  ;;  %v250_v24 = vrot.slane %v105_v10, 1 }
   0x3   :  { %v1126_v3 = vld [vmem:[%s1611_s1 + $0x58] sm:$0xff]  ;;  %235 = vmatpush.bf16.msra.mxu1 %v1118_v2  ;;  %v1125_v7 = vld [vmem:[%s1611_s1 + $0x50] sm:$0xff]  ;;  %v1120_v16 = vld [vmem:[%s1611_s1 + $0x8] sm:$0xff]  ;;  %v121_v18 = vrot.slane %v106_v11, 7  ;;  %v251_v20 = vrot.slane %v106_v11, 1  ;;  %v109_v36 = vpack.c.bf16 %v106_v11, %v105_v10 }
   0x4   :  { %316 = vmatpush.bf16.msra.mxu2 %v1126_v3  ;;  %v53_v8 = vand.u32 15, %v1231_v4  ;;  %v46_v9 = vadd.s32 8, %v1231_v4  ;;  %v108_v12 = vld [vmem:[%s1612_s0 + $0x18] sm:$0xff]  ;;  %vm124_vm0 = vcmp.lt.s32.totalorder %v1231_v4, 1  ;;  %v107_v15 = vld [vmem:[%s1612_s0 + $0x10] sm:$0xff]  ;;  %v1116_v17 = vld [vmem:[%s1611_s1 + $0x28] sm:$0xff] }
   0x5   :  { %v123_v14 = vrot.slane %v108_v12, 7  ;;  %vm254_vm1 = vcmp.lt.s32.totalorder %v1231_v4, 7  ;;  %v1124_v21 = vld [vmem:[%s1611_s1 + $0x48] sm:$0xff]  ;;  %v252_v25 = vrot.slane %v107_v15, 1  ;;  %v1119_v28 = vld [vmem:[%s1611_s1] sm:$0xff]  ;;  %v127_v30 = vsel %vm124_vm0, %v120_v13, %v121_v18  ;;  %v374_v55 = vld [vmem:[%s1613_s7 + $0x78] sm:$0xff] }
   0x6   :  { %187 = vmatpush.bf16.msra.mxu0 %v1121_v5  ;;  %v60_v19 = vand.u32 15, %v46_v9  ;;  %vm1267_vm2 = vcmp.ne.s32.totalorder %v53_v8, 0  ;;  %v1115_v29 = vld [vmem:[%s1611_s1 + $0x20] sm:$0xff]  ;;  %v257_v33 = vsel %vm254_vm1, %v250_v24, %v251_v20  ;;  %v47_v38 = vadd.s32 16, %v1231_v4  ;;  %375 = vmatpush.msra.mxu3 %v374_v55  ;;  %v373_v56 = vld [vmem:[%s1613_s7 + $0x70] sm:$0xff]  ;;  %v372_v57 = vld [vmem:[%s1613_s7 + $0x68] sm:$0xff] }
   0x7   :  { %236 = vmatpush.bf16.msra.mxu1 %v1117_v6  ;;  %v128_v23 = vsel %vm124_vm0, %v123_v14, %v120_v13  ;;  %v256_v27 = vsel %vm254_vm1, %v251_v20, %v252_v25  ;;  %v1123_v32 = vld [vmem:[%s1611_s1 + $0x40] sm:$0xff]  ;;  %v48_v39 = vadd.s32 24, %v1231_v4  ;;  %v122_v41 = vrot.slane %v107_v15, 7  ;;  %v370_v59 = vld [vmem:[%s1613_s7 + $0x58] sm:$0xff]  ;;  %v369_v60 = vld [vmem:[%s1613_s7 + $0x50] sm:$0xff] }
   0x8   :  { %317 = vmatpush.bf16.msra.mxu2 %v1125_v7  ;;  %vm1273_vm3 = vcmp.ne.s32.totalorder %v60_v19, 15  ;;  %v137_v31 = vsel %vm1267_vm2, %v128_v23, 0.0  ;;  %v67_v40 = vand.u32 15, %v47_v38  ;;  %v253_v43 = vrot.slane %v108_v12, 1  ;;  %376 = vmatpush.msra.mxu3 %v373_v56  ;;  %v371_v58 = vld [vmem:[%s1613_s7 + $0x60] sm:$0xff]  ;;  %v368_v61 = vld [vmem:[%s1613_s7 + $0x48] sm:$0xff] }
   0x9   :  { %v268_v34 = vsel %vm1273_vm3, %v256_v27, 0.0  ;;  %v141_v35 = vpack.c.bf16 %v127_v30, %v137_v31  ;;  %v74_v42 = vand.u32 15, %v48_v39  ;;  %v126_v45 = vsel %vm124_vm0, %v121_v18, %v122_v41  ;;  %v367_v0 = vld [vmem:[%s1613_s7 + $0x40] sm:$0xff]  ;;  %v366_v1 = vld [vmem:[%s1613_s7 + $0x38] sm:$0xff]  ;;  %v365_v2 = vld [vmem:[%s1613_s7 + $0x30] sm:$0xff] }
   0xa   :  { %188 = vmatpush.bf16.msra.mxu0 %v1120_v16  ;;  %v271_v37 = vpack.c.bf16 %v268_v34, %v257_v33  ;;  %vm1301_vm5 = vcmp.ne.s32.totalorder %v67_v40, 0  ;;  %v258_v47 = vsel %vm254_vm1, %v253_v43, %v250_v24  ;;  %v125_v48 = vsel %vm124_vm0, %v122_v41, %v123_v14  ;;  %377 = vmatpush.msra.mxu3 %v372_v57  ;;  %v364_v3 = vld [vmem:[%s1613_s7 + $0x28] sm:$0xff]  ;;  %v363_v6 = vld [vmem:[%s1613_s7 + $0x20] sm:$0xff]  ;;  %v362_v9 = vld [vmem:[%s1613_s7 + $0x18] sm:$0xff] }
   0xb   :  { %237 = vmatpush.bf16.msra.mxu1 %v1116_v17  ;;  %vm1307_vm6 = vcmp.ne.s32.totalorder %v74_v42, 15  ;;  %v139_v49 = vsel %vm1301_vm5, %v126_v45, 0.0  ;;  %v255_v50 = vsel %vm254_vm1, %v252_v25, %v253_v43  ;;  %v110_v53 = vpack.c.bf16 %v108_v12, %v107_v15  ;;  %v361_v10 = vld [vmem:[%s1613_s7 + $0x10] sm:$0xff]  ;;  %v360_v11 = vld [vmem:[%s1613_s7 + $0x8] sm:$0xff]  ;;  %v359_v13 = vld [vmem:[%s1613_s7] sm:$0xff] }
   0xc   :  { %318 = vmatpush.bf16.msra.mxu2 %v1124_v21  ;;  %v270_v51 = vsel %vm1307_vm6, %v258_v47, 0.0  ;;  %v142_v52 = vpack.c.bf16 %v125_v48, %v139_v49  ;;  %378 = vmatpush.msra.mxu3 %v371_v58  ;;  %v796_v4 = vld [vmem:[%s1619_s9 + $0x70] sm:$0xff]  ;;  %v795_v44 = vld [vmem:[%s1619_s9 + $0x68] sm:$0xff]  ;;  %v794_v46 = vld [vmem:[%s1619_s9 + $0x60] sm:$0xff] }
   0xd   :  { %v272_v54 = vpack.c.bf16 %v270_v51, %v255_v50 }
   0xe   :  { %189 = vmatpush.bf16.msra.mxu0 %v1119_v28  ;;  %379 = vmatpush.msra.mxu3 %v370_v59 }
   0xf   :  { %238 = vmatpush.bf16.msra.mxu1 %v1115_v29 }
  0x10   :  { %319 = vmatpush.bf16.msra.mxu2 %v1123_v32  ;;  %380 = vmatpush.msra.mxu3 %v369_v60 }
  0x11   :  { %927 = vmatmul.msk.bf16.vlgmr.msra.gmra.mxu0 %vm175_vm4, %v141_v35 }
  0x12   :  { %945 = vmatmul.msk.bf16.vlgmr.msra.gmra.mxu1 %vm175_vm4, %v109_v36  ;;  %381 = vmatpush.msra.mxu3 %v368_v61  ;;  %v426_v61 = vld [vmem:[%s1614_s8] sm:$0xff] }
  0x13   :  { %971 = vmatmul.msk.bf16.vlgmr.msra.gmra.mxu2 %vm175_vm4, %v271_v37 }
  0x14   :  { %382 = vmatpush.msra.mxu3 %v367_v0  ;;  %v1142_v0 = vld [vmem:[%s1615_s2 + $0x38] sm:$0xff] }
  0x15   :  { %571 = vmatpush.bf16.msrb.mxu0 %v1142_v0 }
  0x16   :  { %383 = vmatpush.msra.mxu3 %v366_v1  ;;  %v1133_v1 = vld [vmem:[%s1615_s2 + $0x70] sm:$0xff] }
  0x18   :  { %384 = vmatpush.msra.mxu3 %v365_v2  ;;  %v1149_v2 = vld [vmem:[%s1615_s2 + $0xb0] sm:$0xff] }
  0x1a   :  { %385 = vmatpush.msra.mxu3 %v364_v3 }
  0x1c   :  { %386 = vmatpush.msra.mxu3 %v363_v6 }
  0x1e   :  { %387 = vmatpush.msra.mxu3 %v362_v9  ;;  %v1148_v9 = vld [vmem:[%s1615_s2 + $0xa8] sm:$0xff] }
  0x20   :  { %388 = vmatpush.msra.mxu3 %v361_v10  ;;  %v1140_v10 = vld [vmem:[%s1615_s2 + $0x28] sm:$0xff] }
  0x21   :  { %928 = vmatmul.msk.bf16.gmra.mxu0 %vm175_vm4, %v142_v52 }
  0x22   :  { %946 = vmatmul.msk.bf16.gmra.mxu1 %vm175_vm4, %v110_v53  ;;  %389 = vmatpush.msra.mxu3 %v360_v11 }
  0x23   :  { %972 = vmatmul.msk.bf16.gmra.mxu2 %vm175_vm4, %v272_v54  ;;  %vm1156_vm4 = vmmov 1  }
  0x24   :  { %390 = vmatpush.msra.mxu3 %v359_v13  ;;  %v1131_v13 = vld [vmem:[%s1615_s2 + $0x60] sm:$0xff] }
  0x26   :  { %446 = vmatpush.msrb.mxu3 %v426_v61 }
  0x8e   :  { %v191_v62 = vpop.f32.mrf.mxu0 }
  0x8f   :  { %v240_v63 = vpop.f32.mrf.mxu1 }
  0x90   :  { %v241_v16 = vadd.f32 %v240_v63, %v191_v62  ;;  %v1134_v62 = vld [vmem:[%s1615_s2 + $0x78] sm:$0xff] }
  0x91   :  { %v1150_v63 = vld [vmem:[%s1615_s2 + $0xb8] sm:$0xff]  ;;  %638 = vmatpush.bf16.msrb.mxu1 %v1134_v62 }
  0x92   :  { %736 = vmatpush.bf16.msrb.mxu2 %v1150_v63 }
  0x95   :  { %639 = vmatpush.bf16.msrb.mxu1 %v1133_v1 }
  0x96   :  { %v321_v5 = vpop.f32.mrf.mxu2  ;;  %v193_v7 = vpop.f32.mrf.mxu0  ;;  %737 = vmatpush.bf16.msrb.mxu2 %v1149_v2 }
  0x97   :  { %v242_v8 = vpop.f32.mrf.mxu1  ;;  %v1374_v21 = vadd.f32 %v321_v5, %v241_v16  ;;  %v1141_v5 = vld [vmem:[%s1615_s2 + $0x30] sm:$0xff] }
  0x98   :  { %v243_v17 = vadd.f32 %v242_v8, %v193_v7  ;;  %v1132_v8 = vld [vmem:[%s1615_s2 + $0x68] sm:$0xff]  ;;  %572 = vmatpush.bf16.msrb.mxu0 %v1141_v5 }
  0x99   :  { %v344_v28 = vmul.f32 %v1374_v21, %v1374_v21  ;;  %640 = vmatpush.bf16.msrb.mxu1 %v1132_v8 }
  0x9a   :  { %738 = vmatpush.bf16.msrb.mxu2 %v1148_v9 }
  0x9c   :  { %573 = vmatpush.bf16.msrb.mxu0 %v1140_v10 }
  0x9d   :  { %641 = vmatpush.bf16.msrb.mxu1 %v1131_v13 }
  0x9e   :  { %v323_v12 = vpop.f32.mrf.mxu2  ;;  %v196_v14 = vpop.f32.mrf.mxu0 }
  0x9f   :  { %v245_v15 = vpop.f32.mrf.mxu1  ;;  %v1372_v20 = vadd.f32 %v323_v12, %v243_v17 }
  0xa0   :  { %v246_v18 = vadd.f32 %v245_v15, %v196_v14  ;;  %v1147_v14 = vld [vmem:[%s1615_s2 + $0xa0] sm:$0xff] }
  0xa1   :  { %v345_v27 = vmul.f32 %v1372_v20, %v1372_v20  ;;  %v335_v29 = vadd.f32 %v1372_v20, %v1374_v21  ;;  %v1139_v15 = vld [vmem:[%s1615_s2 + $0x20] sm:$0xff]  ;;  %739 = vmatpush.bf16.msrb.mxu2 %v1147_v14 }
  0xa2   :  { %574 = vmatpush.bf16.msrb.mxu0 %v1139_v15 }
  0xa3   :  { %v348_v33 = vadd.f32 %v345_v27, %v344_v28  ;;  %v419_v28 = vld [vmem:[%s1617_s4] sm:$0x1] }
  0xa6   :  { %v326_v19 = vpop.f32.mrf.mxu2  ;;  %v198_v24 = vpop.f32.mrf.mxu0 }
  0xa7   :  { %v1376_v23 = vadd.f32 %v326_v19, %v246_v18  ;;  %v247_v25 = vpop.f32.mrf.mxu1  ;;  %v1130_v18 = vld [vmem:[%s1615_s2 + $0x58] sm:$0xff] }
  0xa8   :  { %v248_v31 = vadd.f32 %v247_v25, %v198_v24  ;;  %v1146_v19 = vld [vmem:[%s1615_s2 + $0x98] sm:$0xff]  ;;  %642 = vmatpush.bf16.msrb.mxu1 %v1130_v18  ;;  %v401_v24 = vld [vmem:[%s1616_s3] sm:$0x1] }
  0xa9   :  { %v346_v30 = vmul.f32 %v1376_v23, %v1376_v23  ;;  %v336_v34 = vadd.f32 %v335_v29, %v1376_v23  ;;  %740 = vmatpush.bf16.msrb.mxu2 %v1146_v19  ;;  %v797_v19 = vld [vmem:[%s1619_s9 + $0x78] sm:$0xff] }
  0xab   :  { %v349_v36 = vadd.f32 %v348_v33, %v346_v30  ;;  %v1138_v33 = vld [vmem:[%s1615_s2 + $0x18] sm:$0xff] }
  0xac   :  { %575 = vmatpush.bf16.msrb.mxu0 %v1138_v33 }
  0xae   :  { %v328_v32 = vpop.f32.mrf.mxu2 }
  0xaf   :  { %v1387_v35 = vadd.f32 %v328_v32, %v248_v31 }
  0xb1   :  { %v337_v37 = vadd.f32 %v336_v34, %v1387_v35  ;;  %v347_v38 = vmul.f32 %v1387_v35, %v1387_v35  ;;  %v1129_v34 = vld [vmem:[%s1615_s2 + $0x50] sm:$0xff] }
  0xb2   :  { %643 = vmatpush.bf16.msrb.mxu1 %v1129_v34 }
  0xb3   :  { %v338_v39 = vrot.slane %v337_v37, 4  ;;  %v350_v40 = vadd.f32 %v349_v36, %v347_v38  ;;  %v1145_v36 = vld [vmem:[%s1615_s2 + $0x90] sm:$0xff]  ;;  %v1128_v38 = vld [vmem:[%s1615_s2 + $0x48] sm:$0xff] }
  0xb4   :  { %741 = vmatpush.bf16.msrb.mxu2 %v1145_v36  ;;  %v787_v36 = vld [vmem:[%s1619_s9 + $0x28] sm:$0xff] }
  0xb5   :  { %v339_v41 = vadd.f32 %v338_v39, %v337_v37  ;;  %v351_v42 = vrot.slane %v350_v40, 4  ;;  %v1137_v37 = vld [vmem:[%s1615_s2 + $0x10] sm:$0xff]  ;;  %v1144_v39 = vld [vmem:[%s1615_s2 + $0x88] sm:$0xff] }
  0xb6   :  { %576 = vmatpush.bf16.msrb.mxu0 %v1137_v37  ;;  %644 = vmatpush.bf16.msrb.mxu1 %v1128_v38  ;;  %v786_v38 = vld [vmem:[%s1619_s9 + $0x20] sm:$0xff] }
  0xb7   :  { %v340_v43 = vrot.slane %v339_v41, 2  ;;  %v352_v45 = vadd.f32 %v351_v42, %v350_v40  ;;  %v1136_v40 = vld [vmem:[%s1615_s2 + $0x8] sm:$0xff]  ;;  %v1143_v42 = vld [vmem:[%s1615_s2 + $0x80] sm:$0xff] }
  0xb8   :  { %742 = vmatpush.bf16.msrb.mxu2 %v1144_v39  ;;  %v785_v39 = vld [vmem:[%s1619_s9 + $0x18] sm:$0xff] }
  0xb9   :  { %v341_v47 = vadd.f32 %v340_v43, %v339_v41  ;;  %v353_v48 = vrot.slane %v352_v45, 2  ;;  %v1127_v41 = vld [vmem:[%s1615_s2 + $0x40] sm:$0xff] }
  0xba   :  { %577 = vmatpush.bf16.msrb.mxu0 %v1136_v40  ;;  %645 = vmatpush.bf16.msrb.mxu1 %v1127_v41  ;;  %v1135_v43 = vld [vmem:[%s1615_s2] sm:$0xff]  ;;  %v784_v40 = vld [vmem:[%s1619_s9 + $0x10] sm:$0xff]  ;;  %v783_v41 = vld [vmem:[%s1619_s9 + $0x8] sm:$0xff] }
  0xbb   :  { %v342_v49 = vrot.slane %v341_v47, 1  ;;  %v354_v50 = vadd.f32 %v353_v48, %v352_v45 }
  0xbc   :  { %743 = vmatpush.bf16.msrb.mxu2 %v1143_v42 }
  0xbd   :  { %v355_v51 = vrot.slane %v354_v50, 1  ;;  %v343_v52 = vadd.f32 %v342_v49, %v341_v47 }
  0xbe   :  { %578 = vmatpush.bf16.msrb.mxu0 %v1135_v43  ;;  %v782_v43 = vld [vmem:[%s1619_s9] sm:$0xff] }
  0xbf   :  { %v356_v53 = vadd.f32 %v355_v51, %v354_v50 }
  0xc1   :  { %v358_v54 = vsel %vm357_vm7, %v343_v52, %v356_v53  ;;  %v1483_v53 = vstv %s1618_s11 }
  0xc2   :  { %391 = vmatmul.f32.vlgmr.msra.gmra.mxu3 %v358_v54 }
  0xc3   :  { %798 = vmatpush.msra.mxu3 %v797_v19 }
  0xc5   :  { %799 = vmatpush.msra.mxu3 %v796_v4 }
  0xc7   :  { %800 = vmatpush.msra.mxu3 %v795_v44  ;;  %v849_v44 = vld [vmem:[%s1620_s10] sm:$0xff] }
  0xc8   :  { %868 = vmatpush.msra.mxu0 %v849_v44 }
  0xc9   :  { %801 = vmatpush.msra.mxu3 %v794_v46 }
 0x145   :  { %v392_v55 = vpop.f32.mrf.mxu3 }
 0x146   :  { %v395_v56 = vmul.f32 0.001953125, %v392_v55 }
 0x148   :  { %v396_v57 = vmul.f32 %v395_v56, %v395_v56 }
 0x14a   :  { %v398_v58 = vrot.slane %v396_v57, 7 }
 0x14c   :  { %v400_v59 = vsub.f32 %v395_v56, %v398_v58 }
 0x14e   :  { %v402_v60 = vadd.f32 1e-05, %v400_v59 }
 0x150   :  { %1152 = vrsqrt.f32 %v402_v60  ;;  %vm409_vm9 = vweird.f32 %v402_v60 }
 0x156   :  { %v1153_v3 = vpop.eup %1152 }
 0x157   :  { %v404_v6 = vmul.f32 %v1153_v3, %v402_v60  ;;  %vm410_vm8 = vweird.f32 %v1153_v3 }
 0x158   :  { %vm411_vm10 = vmor %vm409_vm9, %vm410_vm8 }
 0x159   :  { %v405_v7 = vmul.f32 %v1153_v3, %v404_v6  ;;  %vm1022_vm8 = vmpackc.low %vm1156_vm4, %vm1267_vm2 }
 0x15a   :  { %vm1108_vm9 = vmpackc.low %vm1273_vm3, %vm1156_vm4 }
 0x15b   :  { %v406_v11 = vmul.f32 0.5, %v405_v7  ;;  %vm1025_vm2 = vmpackc.low %vm1156_vm4, %vm1301_vm5 }
 0x15c   :  { %vm1111_vm3 = vmpackc.low %vm1307_vm6, %vm1156_vm4 }
 0x15d   :  { %v407_v12 = vsub.f32 1.5, %v406_v11 }
 0x15f   :  { %v408_v16 = vmul.f32 %v1153_v3, %v407_v12 }
 0x161   :  { %v412_v17 = vsel %vm411_vm10, %v1153_v3, %v408_v16 }
 0x162   :  { %414 = vst [vmem:[#allocation1] sm:$0xff] %v412_v17 }
 0x169   :  { %v416_v25 = vld [vmem:[#allocation1 + $0x1] ss:$9 sm:$0xff] }
 0x16a   :  { %v418_v27 = vmul.f32 %v416_v25, %v401_v24  ;;  %v793_v24 = vld [vmem:[%s1619_s9 + $0x58] sm:$0xff]  ;;  %v792_v25 = vld [vmem:[%s1619_s9 + $0x50] sm:$0xff] }
 0x16b   :  { %802 = vmatpush.msra.mxu3 %v793_v24 }
 0x16c   :  { %v420_v29 = vmul.f32 %v418_v27, %v395_v56 }
 0x16d   :  { %803 = vmatpush.msra.mxu3 %v792_v25 }
 0x16e   :  { %v421_v30 = vsub.f32 %v419_v28, %v420_v29  ;;  %v791_v29 = vld [vmem:[%s1619_s9 + $0x48] sm:$0xff] }
 0x16f   :  { %804 = vmatpush.msra.mxu3 %v791_v29 }
 0x170   :  { %v423_v31 = vperm.slane %v421_v30, 0  ;;  %v790_v30 = vld [vmem:[%s1619_s9 + $0x40] sm:$0xff] }
 0x171   :  { %805 = vmatpush.msra.mxu3 %v790_v30 }
 0x172   :  { %v425_v32 = vsel %vm357_vm7, %v418_v27, %v423_v31  ;;  %v789_v31 = vld [vmem:[%s1619_s9 + $0x38] sm:$0xff] }
 0x173   :  { %973 = vmatmul.msk.f32.vlgmr.msrb.gmra.mxu3 %vm427_vm11, %v425_v32  ;;  %v788_v32 = vld [vmem:[%s1619_s9 + $0x30] sm:$0xff] }
 0x174   :  { %806 = vmatpush.msra.mxu3 %v789_v31  ;;  %v824_v31 = vld [vmem:[%s1621_s5] sm:$0x1] }
 0x176   :  { %807 = vmatpush.msra.mxu3 %v788_v32 }
 0x178   :  { %808 = vmatpush.msra.mxu3 %v787_v36 }
 0x17a   :  { %809 = vmatpush.msra.mxu3 %v786_v38 }
 0x17c   :  { %810 = vmatpush.msra.mxu3 %v785_v39 }
 0x17e   :  { %811 = vmatpush.msra.mxu3 %v784_v40 }
 0x180   :  { %812 = vmatpush.msra.mxu3 %v783_v41 }
 0x182   :  { %813 = vmatpush.msra.mxu3 %v782_v43 }
 0x1f6   :  { %v448_v45 = vpop.f32.mrf.mxu3 }
 0x1f7   :  { %v451_v47 = vperm.slane %v448_v45, 0  ;;  %v456_v48 = vperm.slane %v448_v45, 1 }
 0x1f9   :  { %v452_v49 = vmul.f32 %v451_v47, %v1374_v21  ;;  %v453_v50 = vmul.f32 %v451_v47, %v1372_v20  ;;  %v454_v51 = vmul.f32 %v451_v47, %v1376_v23  ;;  %v455_v52 = vmul.f32 %v451_v47, %v1387_v35 }
 0x1fb   :  { %v457_v54 = vadd.f32 %v456_v48, %v452_v49  ;;  %v458_v55 = vadd.f32 %v456_v48, %v453_v50  ;;  %v459_v56 = vadd.f32 %v456_v48, %v454_v51  ;;  %v460_v57 = vadd.f32 %v456_v48, %v455_v52 }
 0x1fd   :  { %vm463_vm12 = vcmp.ge.f32.partialorder %v459_v56, 0.0  ;;  %vm464_vm13 = vcmp.ge.f32.partialorder %v460_v57, 0.0  ;;  %v468_v58 = vmul.f32 %v1483_v53, %v459_v56  ;;  %v469_v21 = vmul.f32 %v1483_v53, %v460_v57 }
 0x1fe   :  { %vm461_vm14 = vcmp.ge.f32.partialorder %v457_v54, 0.0  ;;  %vm462_vm15 = vcmp.ge.f32.partialorder %v458_v55, 0.0  ;;  %v466_v20 = vmul.f32 %v1483_v53, %v457_v54  ;;  %v467_v23 = vmul.f32 %v1483_v53, %v458_v55 }
 0x1ff   :  { %v472_v35 = vsel %vm463_vm12, %v459_v56, %v468_v58  ;;  %v473_v59 = vsel %vm464_vm13, %v460_v57, %v469_v21 }
 0x200   :  { %v470_v60 = vsel %vm461_vm14, %v457_v54, %v466_v20  ;;  %v471_v61 = vsel %vm462_vm15, %v458_v55, %v467_v23  ;;  %v496_v62 = vrot.slane %v473_v59, 7  ;;  %v659_v63 = vrot.slane %v472_v35, 1 }
 0x201   :  { %v474_v0 = vpack.c.bf16 %v471_v61, %v470_v60  ;;  %v493_v1 = vrot.slane %v470_v60, 7  ;;  %v494_v2 = vrot.slane %v471_v61, 7  ;;  %v657_v3 = vrot.slane %v470_v60, 1 }
 0x202   :  { %v658_v5 = vrot.slane %v471_v61, 1  ;;  %v495_v12 = vrot.slane %v472_v35, 7  ;;  %v660_v13 = vrot.slane %v473_v59, 1  ;;  %v475_v14 = vpack.c.bf16 %v473_v59, %v472_v35 }
 0x203   :  { %646 = vmatmul.bf16.vlgmr.msrb.gmra.mxu1 %v474_v0  ;;  %v499_v6 = vsel %vm124_vm0, %v493_v1, %v494_v2  ;;  %v500_v7 = vsel %vm124_vm0, %v496_v62, %v493_v1 }
 0x204   :  { %v1023_v8 = vpack.c.bf16 %v499_v6, %v500_v7  ;;  %v662_v9 = vsel %vm254_vm1, %v658_v5, %v659_v63  ;;  %v663_v10 = vsel %vm254_vm1, %v657_v3, %v658_v5  ;;  %v497_v22 = vsel %vm124_vm0, %v495_v12, %v496_v62 }
 0x205   :  { %v1109_v11 = vpack.c.bf16 %v662_v9, %v663_v10  ;;  %v498_v15 = vsel %vm124_vm0, %v494_v2, %v495_v12  ;;  %v661_v16 = vsel %vm254_vm1, %v659_v63, %v660_v13  ;;  %v664_v17 = vsel %vm254_vm1, %v660_v13, %v657_v3 }
 0x206   :  { %1024 = vmatmul.msk.bf16.vlgmr.msrb.gmra.mxu0 %vm1022_vm8, %v1023_v8  ;;  %v1026_v26 = vpack.c.bf16 %v497_v22, %v498_v15  ;;  %v1112_v18 = vpack.c.bf16 %v664_v17, %v661_v16 }
 0x207   :  { %1110 = vmatmul.msk.bf16.vlgmr.msrb.gmra.mxu2 %vm1108_vm9, %v1109_v11 }
 0x213   :  { %651 = vmatmul.bf16.gmra.mxu1 %v475_v14 }
 0x216   :  { %1027 = vmatmul.msk.bf16.gmra.mxu0 %vm1025_vm2, %v1026_v26 }
 0x217   :  { %1113 = vmatmul.msk.bf16.gmra.mxu2 %vm1111_vm3, %v1112_v18 }
 0x280   :  { %v647_v27 = vpop.f32.mrf.mxu1 }
 0x283   :  { %v580_v28 = vpop.f32.mrf.mxu0 }
 0x284   :  { %v648_v50 = vadd.f32 %v647_v27, %v580_v28 }
 0x288   :  { %v649_v37 = vpop.f32.mrf.mxu1 }
 0x28a   :  { %v745_v33 = vpop.f32.mrf.mxu2 }
 0x28b   :  { %v582_v34 = vpop.f32.mrf.mxu0  ;;  %v1567_v54 = vadd.f32 %v745_v33, %v648_v50 }
 0x28c   :  { %v650_v48 = vadd.f32 %v649_v37, %v582_v34  ;;  %v842_v34 = vld [vmem:[%s1622_s6] sm:$0x1] }
 0x28d   :  { %v768_v21 = vmul.f32 %v1567_v54, %v1567_v54 }
 0x290   :  { %v652_v47 = vpop.f32.mrf.mxu1 }
 0x292   :  { %v747_v42 = vpop.f32.mrf.mxu2 }
 0x293   :  { %v585_v45 = vpop.f32.mrf.mxu0  ;;  %v1565_v51 = vadd.f32 %v747_v42, %v650_v48 }
 0x294   :  { %v653_v52 = vadd.f32 %v652_v47, %v585_v45 }
 0x295   :  { %v769_v57 = vmul.f32 %v1565_v51, %v1565_v51  ;;  %v759_v20 = vadd.f32 %v1565_v51, %v1567_v54 }
 0x297   :  { %v772_v60 = vadd.f32 %v769_v57, %v768_v21 }
 0x298   :  { %v654_v58 = vpop.f32.mrf.mxu1 }
 0x29a   :  { %v750_v49 = vpop.f32.mrf.mxu2 }
 0x29b   :  { %v1569_v55 = vadd.f32 %v750_v49, %v653_v52  ;;  %v587_v56 = vpop.f32.mrf.mxu0 }
 0x29c   :  { %v655_v35 = vadd.f32 %v654_v58, %v587_v56 }
 0x29d   :  { %v770_v23 = vmul.f32 %v1569_v55, %v1569_v55  ;;  %v760_v61 = vadd.f32 %v759_v20, %v1569_v55 }
 0x29f   :  { %v773_v63 = vadd.f32 %v772_v60, %v770_v23 }
 0x2a2   :  { %v752_v59 = vpop.f32.mrf.mxu2 }
 0x2a3   :  { %v758_v62 = vadd.f32 %v752_v59, %v655_v35 }
 0x2a5   :  { %v761_v0 = vadd.f32 %v760_v61, %v758_v62  ;;  %v771_v1 = vmul.f32 %v758_v62, %v758_v62 }
 0x2a7   :  { %v762_v2 = vrot.slane %v761_v0, 4  ;;  %v774_v3 = vadd.f32 %v773_v63, %v771_v1 }
 0x2a9   :  { %v763_v5 = vadd.f32 %v762_v2, %v761_v0  ;;  %v775_v6 = vrot.slane %v774_v3, 4 }
 0x2ab   :  { %v764_v7 = vrot.slane %v763_v5, 2  ;;  %v776_v8 = vadd.f32 %v775_v6, %v774_v3 }
 0x2ad   :  { %v765_v9 = vadd.f32 %v764_v7, %v763_v5  ;;  %v777_v10 = vrot.slane %v776_v8, 2 }
 0x2af   :  { %v766_v11 = vrot.slane %v765_v9, 1  ;;  %v778_v12 = vadd.f32 %v777_v10, %v776_v8 }
 0x2b1   :  { %v779_v13 = vrot.slane %v778_v12, 1  ;;  %v767_v14 = vadd.f32 %v766_v11, %v765_v9 }
 0x2b3   :  { %v780_v22 = vadd.f32 %v779_v13, %v778_v12 }
 0x2b5   :  { %v781_v15 = vsel %vm357_vm7, %v767_v14, %v780_v22 }
 0x2b6   :  { %814 = vmatmul.f32.vlgmr.msra.gmra.mxu3 %v781_v15 }
 0x339   :  { %v815_v16 = vpop.f32.mrf.mxu3 }
 0x33a   :  { %v818_v17 = vmul.f32 0.001953125, %v815_v16 }
 0x33c   :  { %v819_v26 = vmul.f32 %v818_v17, %v818_v17 }
 0x33e   :  { %v821_v18 = vrot.slane %v819_v26, 7 }
 0x340   :  { %v823_v19 = vsub.f32 %v818_v17, %v821_v18 }
 0x342   :  { %v825_v4 = vadd.f32 1e-05, %v823_v19 }
 0x344   :  { %1154 = vrsqrt.f32 %v825_v4  ;;  %vm832_vm1 = vweird.f32 %v825_v4 }
 0x34a   :  { %v1155_v46 = vpop.eup %1154 }
 0x34b   :  { %v827_v24 = vmul.f32 %v1155_v46, %v825_v4  ;;  %vm833_vm0 = vweird.f32 %v1155_v46 }
 0x34c   :  { %vm834_vm5 = vmor %vm832_vm1, %vm833_vm0 }
 0x34d   :  { %v828_v25 = vmul.f32 %v1155_v46, %v827_v24 }
 0x34f   :  { %v829_v27 = vmul.f32 0.5, %v828_v25 }
 0x351   :  { %v830_v28 = vsub.f32 1.5, %v829_v27 }
 0x353   :  { %v831_v29 = vmul.f32 %v1155_v46, %v830_v28 }
 0x355   :  { %v835_v30 = vsel %vm834_vm5, %v1155_v46, %v831_v29 }
 0x356   :  { %837 = vst [vmem:[#allocation1] sm:$0xff] %v835_v30 }
 0x35d   :  { %v839_v32 = vld [vmem:[#allocation1 + $0x1] ss:$9 sm:$0xff] }
 0x35e   :  { %v841_v33 = vmul.f32 %v839_v32, %v824_v31 }
 0x360   :  { %v843_v36 = vmul.f32 %v841_v33, %v818_v17 }
 0x362   :  { %v844_v37 = vsub.f32 %v842_v34, %v843_v36 }
 0x364   :  { %v846_v38 = vperm.slane %v844_v37, 0 }
 0x366   :  { %v848_v39 = vsel %vm357_vm7, %v841_v33, %v846_v38 }
 0x367   :  { %1114 = vmatmul.msk.f32.vlgmr.msra.gmra.mxu0 %vm427_vm11, %v848_v39 }
 0x3e4   :  { %v870_v40 = vpop.f32.mrf.mxu0 }
 0x3e5   :  { %v873_v41 = vperm.slane %v870_v40, 0  ;;  %v878_v42 = vperm.slane %v870_v40, 1 }
 0x3e7   :  { %v874_v43 = vmul.f32 %v873_v41, %v1567_v54  ;;  %v875_v45 = vmul.f32 %v873_v41, %v1565_v51  ;;  %v876_v47 = vmul.f32 %v873_v41, %v1569_v55  ;;  %v877_v48 = vmul.f32 %v873_v41, %v758_v62 }
 0x3e9   :  { %v879_v49 = vadd.f32 %v878_v42, %v874_v43  ;;  %v880_v50 = vadd.f32 %v878_v42, %v875_v45  ;;  %v881_v52 = vadd.f32 %v878_v42, %v876_v47  ;;  %v882_v56 = vadd.f32 %v878_v42, %v877_v48 }
 0x3eb   :  { %vm883_vm6 = vcmp.ge.f32.partialorder %v879_v49, 0.0  ;;  %vm884_vm10 = vcmp.ge.f32.partialorder %v880_v50, 0.0  ;;  %vm885_vm12 = vcmp.ge.f32.partialorder %v881_v52, 0.0  ;;  %vm886_vm7 = vcmp.ge.f32.partialorder %v882_v56, 0.0 }
 0x3ec   :  { %v887_v57 = vmul.f32 %v879_v49, %v1483_v53  ;;  %v888_v58 = vmul.f32 %v880_v50, %v1483_v53  ;;  %v889_v21 = vmul.f32 %v881_v52, %v1483_v53  ;;  %v890_v54 = vmul.f32 %v882_v56, %v1483_v53 }
 0x3ee   :  { %v891_v51 = vsel %vm883_vm6, %v879_v49, %v887_v57  ;;  %v892_v20 = vsel %vm884_vm10, %v880_v50, %v888_v58  ;;  %v893_v55 = vsel %vm885_vm12, %v881_v52, %v889_v21  ;;  %v894_v23 = vsel %vm886_vm7, %v882_v56, %v890_v54 }
 0x3ef   :  { %895 = vst [vmem:[%s1623_s12] sm:$0xff] %v891_v51 }
 0x3f0   :  { %896 = vst [vmem:[%s1623_s12 + $0x8] sm:$0xff] %v892_v20 }
 0x3f1   :  { %897 = vst [vmem:[%s1623_s12 + $0x10] sm:$0xff] %v893_v55 }
 0x3f2   :  { %898 = vst [vmem:[%s1623_s12 + $0x18] sm:$0xff] %v894_v23 }

</bundles_post_ra>
